<compile_context>
chip_gen: v6e
topology: v6e:2x2x1
jax: 0.10.0
libtpu: 0.0.40
codegen_flags: <defaults>
</compile_context>

<pallas_src>
import jax
import jax.numpy as jnp
import numpy as np
from jax.experimental import pallas as pl
from jax.experimental.pallas import tpu as pltpu

EMBED = 20  # per-layer embedding size in NodeGCN (embedding_size = 3 * 20)


def _round_up(v, m):
    return ((v + m - 1) // m) * m


def _choose_tiles(n, max_tile_m=256, max_tile_k=2048):
    """Pick (tile_m, tile_k, n_pad): tile_m capped (megacore), tile_k a big strip."""
    n128 = _round_up(n, 128)
    tile_m = min(max_tile_m, n128)
    n_pad = _round_up(n128, tile_m)
    nk = n_pad // tile_m
    # largest k-strip that divides n_pad, is a multiple of tile_m, and <= max_tile_k
    f = max(d for d in range(1, nk + 1) if nk % d == 0 and d * tile_m <= max_tile_k)
    return tile_m, f * tile_m, n_pad


# ---------------------------------------------------------------------------
# Kernels
# ---------------------------------------------------------------------------
def _gcn_layer_kernel(a_ref, xw_ref, b_ref, h_ref, acc_ref):
    """Layers 1/2: accumulate A[i, k] @ XW[k] over k; bias+L2norm+ReLU at last k."""
    k = pl.program_id(1)
    tile_k = a_ref.shape[1]

    @pl.when(k == 0)
    def _():
        acc_ref[...] = jnp.zeros_like(acc_ref)

    start = pl.multiple_of(k * tile_k, tile_k)
    acc_ref[...] += jnp.dot(
        a_ref[...], xw_ref[pl.ds(start, tile_k), :],
        preferred_element_type=jnp.float32,
    )

    @pl.when(k == pl.num_programs(1) - 1)
    def _():
        h = acc_ref[...] + b_ref[...]
        # F.normalize(h, p=2, dim=1): h / max(||h||, 1e-12) == h * rsqrt(max(sumsq, 1e-24))
        sumsq = jnp.sum(h * h, axis=1, keepdims=True)
        h = h * jax.lax.rsqrt(jnp.maximum(sumsq, 1e-24))
        h_ref[...] = jnp.maximum(h, 0.0).astype(h_ref.dtype)  # ReLU, stored bf16


def _gcn_layer_head_kernel(a_ref, xw_ref, b_ref, h1_ref, h2_ref,
                           w1_ref, w2_ref, w3_ref, lb_ref, o_ref, acc_ref):
    """Layer 3 + fused Linear head: logits = h1@W[:20] + h2@W[20:40] + h3@W[40:] + b."""
    k = pl.program_id(1)
    tile_k = a_ref.shape[1]

    @pl.when(k == 0)
    def _():
        acc_ref[...] = jnp.zeros_like(acc_ref)

    start = pl.multiple_of(k * tile_k, tile_k)
    acc_ref[...] += jnp.dot(
        a_ref[...], xw_ref[pl.ds(start, tile_k), :],
        preferred_element_type=jnp.float32,
    )

    @pl.when(k == pl.num_programs(1) - 1)
    def _():
        h = acc_ref[...] + b_ref[...]
        sumsq = jnp.sum(h * h, axis=1, keepdims=True)
        h3 = jnp.maximum(h * jax.lax.rsqrt(jnp.maximum(sumsq, 1e-24)), 0.0)
        o_ref[...] = (
            jnp.dot(h1_ref[...].astype(jnp.float32), w1_ref[...],
                    preferred_element_type=jnp.float32)
            + jnp.dot(h2_ref[...].astype(jnp.float32), w2_ref[...],
                      preferred_element_type=jnp.float32)
            + jnp.dot(h3, w3_ref[...], preferred_element_type=jnp.float32)
            + lb_ref[...]
        )


# ---------------------------------------------------------------------------
# pallas_call wrappers
# ---------------------------------------------------------------------------
_VMEM_LIMIT = 48 * 1024 * 1024  # fits v7x's 64 MiB physical VMEM with headroom


def _gcn_layer_call(a_bf16, xw_bf16, b, *, tile_m, tile_k):
    n_pad = a_bf16.shape[0]
    e = xw_bf16.shape[1]
    grid = (n_pad // tile_m, n_pad // tile_k)
    return pl.pallas_call(
        _gcn_layer_kernel,
        out_shape=jax.ShapeDtypeStruct((n_pad, e), jnp.bfloat16),
        grid_spec=pltpu.PrefetchScalarGridSpec(
            num_scalar_prefetch=0,
            grid=grid,
            in_specs=[
                pl.BlockSpec((tile_m, tile_k), lambda i, k: (i, k)),  # A strip (bf16, streamed)
                pl.BlockSpec((n_pad, e), lambda i, k: (0, 0)),        # XW (bf16, VMEM-resident)
                pl.BlockSpec((1, e), lambda i, k: (0, 0)),            # layer bias (resident)
            ],
            out_specs=pl.BlockSpec((tile_m, e), lambda i, k: (i, 0)),
            scratch_shapes=[pltpu.VMEM((tile_m, e), jnp.float32)],
        ),
        compiler_params=pltpu.CompilerParams(
            dimension_semantics=("parallel", "arbitrary"),
            vmem_limit_bytes=_VMEM_LIMIT,
        ),
    )(a_bf16, xw_bf16, b.reshape(1, e))


def _gcn_layer_head_call(a_bf16, xw_bf16, b, h1, h2, lin_w, lin_b, *, tile_m, tile_k):
    n_pad = a_bf16.shape[0]
    e = xw_bf16.shape[1]
    c = lin_w.shape[1]
    grid = (n_pad // tile_m, n_pad // tile_k)
    row_h_spec = pl.BlockSpec((tile_m, e), lambda i, k: (i, 0))
    w_spec = pl.BlockSpec((e, c), lambda i, k: (0, 0))
    return pl.pallas_call(
        _gcn_layer_head_kernel,
        out_shape=jax.ShapeDtypeStruct((n_pad, c), jnp.float32),
        grid_spec=pltpu.PrefetchScalarGridSpec(
            num_scalar_prefetch=0,
            grid=grid,
            in_specs=[
                pl.BlockSpec((tile_m, tile_k), lambda i, k: (i, k)),  # A strip
                pl.BlockSpec((n_pad, e), lambda i, k: (0, 0)),        # XW3 resident
                pl.BlockSpec((1, e), lambda i, k: (0, 0)),            # b3
                row_h_spec, row_h_spec,                               # h1, h2 row tiles
                w_spec, w_spec, w_spec,                               # lin_w pre-split
                pl.BlockSpec((1, c), lambda i, k: (0, 0)),            # lin_b
            ],
            out_specs=pl.BlockSpec((tile_m, c), lambda i, k: (i, 0)),
            scratch_shapes=[pltpu.VMEM((tile_m, e), jnp.float32)],
        ),
        compiler_params=pltpu.CompilerParams(
            dimension_semantics=("parallel", "arbitrary"),
            vmem_limit_bytes=_VMEM_LIMIT,
        ),
    )(a_bf16, xw_bf16, b.reshape(1, e), h1, h2,
      lin_w[:e], lin_w[e:2 * e], lin_w[2 * e:], lin_b.reshape(1, c))


# ---------------------------------------------------------------------------
# Graph glue + forward
# ---------------------------------------------------------------------------
def _normalized_adjacency(edge_index, edge_weights, n, n_pad, dtype=jnp.bfloat16):
    """Dense PyG-style D^-1/2 (A + I) D^-1/2, zero-padded to (n_pad, n_pad).

    Scatters straight into the final `dtype` buffer — exactly one O(N^2)
    materialization (no f32 intermediate + cast).
    """
    loop_idx = jnp.arange(n, dtype=edge_index.dtype)
    row = jnp.concatenate([edge_index[0], loop_idx])  # source
    col = jnp.concatenate([edge_index[1], loop_idx])  # target / dst
    w = jnp.concatenate([edge_weights.astype(jnp.float32), jnp.ones((n,), jnp.float32)])
    deg = jnp.zeros((n,), jnp.float32).at[col].add(w)
    dinv = jnp.where(deg > 0, jax.lax.rsqrt(deg), 0.0)
    norm = dinv[row] * w * dinv[col]
    # out[i] = sum_j a_hat[i, j] * (x[j] @ W)
    return jnp.zeros((n_pad, n_pad), dtype).at[col, row].add(norm.astype(dtype))


def _pad_rows(m, n_pad):
    n = m.shape[0]
    if n == n_pad:
        return m
    return jnp.zeros((n_pad,) + m.shape[1:], m.dtype).at[:n].set(m)


def node_gcn_forward(x, edge_index, params, edge_weights=None,
                     *, max_tile_m=256, max_tile_k=2048):
    """NodeGCN forward. x: (N, F) f32, edge_index: (2, E) int32 -> (N, num_classes)."""
    n, _ = x.shape
    n_edges = edge_index.shape[1]
    if edge_weights is None:
        edge_weights = jnp.ones((n_edges,), dtype=jnp.float32)

    tile_m, tile_k, n_pad = _choose_tiles(n, max_tile_m, max_tile_k)

    a_bf16 = _normalized_adjacency(edge_index, edge_weights, n, n_pad)  # built once, reused 3x

    # XW hoisted out of the kernels: tiny (N,F)@(F,20) matmuls, bf16 for the MXU stream.
    xw1 = _pad_rows((x.astype(jnp.float32) @ params["w1"]).astype(jnp.bfloat16), n_pad)
    h1 = _gcn_layer_call(a_bf16, xw1, params["b1"], tile_m=tile_m, tile_k=tile_k)

    xw2 = (h1.astype(jnp.float32) @ params["w2"]).astype(jnp.bfloat16)
    h2 = _gcn_layer_call(a_bf16, xw2, params["b2"], tile_m=tile_m, tile_k=tile_k)

    xw3 = (h2.astype(jnp.float32) @ params["w3"]).astype(jnp.bfloat16)
    # Layer 3 with the Linear head fused into its epilogue (h3 never hits HBM).
    out = _gcn_layer_head_call(a_bf16, xw3, params["b3"], h1, h2,
                               params["lin_w"], params["lin_b"],
                               tile_m=tile_m, tile_k=tile_k)
    return out[:n]


def node_gcn_reference(x, edge_index, params, edge_weights=None):
    """Pure-JAX f32 reference of NodeGCN.forward for validation."""
    n = x.shape[0]
    if edge_weights is None:
        edge_weights = jnp.ones((edge_index.shape[1],), jnp.float32)
    a_hat = _normalized_adjacency(edge_index, edge_weights, n, n, dtype=jnp.float32)

    def layer(h, w, b):
        h = a_hat @ (h @ w) + b
        nrm = jnp.sqrt(jnp.sum(h * h, axis=1, keepdims=True))
        h = h / jnp.maximum(nrm, 1e-12)
        return jnp.maximum(h, 0.0)

    h1 = layer(x, params["w1"], params["b1"])
    h2 = layer(h1, params["w2"], params["b2"])
    h3 = layer(h2, params["w3"], params["b3"])
    return jnp.concatenate([h1, h2, h3], axis=1) @ params["lin_w"] + params["lin_b"]


if __name__ == "__main__":
    key = jax.random.PRNGKey(0)
    keys = jax.random.split(key, 9)

    N, F, C = 16, 4, 3
    x = jax.random.normal(keys[0], (N, F), dtype=jnp.float32)

    # deterministic small graph: ring + a few chords, undirected (both directions)
    src, dst = [], []
    for i in range(N):
        src += [i, (i + 1) % N]
        dst += [(i + 1) % N, i]
    for a, b in [(0, 8), (3, 11), (5, 13)]:
        src += [a, b]
        dst += [b, a]
    edge_index = jnp.array([src, dst], dtype=jnp.int32)

    params = {
        "w1": jax.random.normal(keys[1], (F, EMBED), jnp.float32) * 0.1,
        "b1": jax.random.normal(keys[2], (EMBED,), jnp.float32) * 0.1,
        "w2": jax.random.normal(keys[3], (EMBED, EMBED), jnp.float32) * 0.1,
        "b2": jax.random.normal(keys[4], (EMBED,), jnp.float32) * 0.1,
        "w3": jax.random.normal(keys[5], (EMBED, EMBED), jnp.float32) * 0.1,
        "b3": jax.random.normal(keys[6], (EMBED,), jnp.float32) * 0.1,
        "lin_w": jax.random.normal(keys[7], (3 * EMBED, C), jnp.float32) * 0.1,
        "lin_b": jax.random.normal(keys[8], (C,), jnp.float32) * 0.1,
    }

    out = node_gcn_forward(x, edge_index, params)
    out = jax.block_until_ready(out)
    assert out.shape == (N, C), out.shape

    ref = node_gcn_reference(x, edge_index, params)
    np.testing.assert_allclose(np.asarray(out), np.asarray(ref), rtol=5e-2, atol=5e-2)

    print("KERNEL_OK")
</pallas_src>

<mosaic_0001>
module attributes {stable_mosaic.version = 11 : i64} {
  func.func @_gcn_layer_kernel(%arg0: i32, %arg1: i32, %arg2: memref<128x128xbf16, #tpu.memory_space<vmem>>, %arg3: memref<128x20xbf16, #tpu.memory_space<vmem>>, %arg4: memref<1x20xf32, #tpu.memory_space<vmem>>, %arg5: memref<128x20xbf16, #tpu.memory_space<vmem>>, %arg6: memref<128x20xf32, #tpu.memory_space<vmem>>) attributes {dimension_semantics = [#tpu.dimension_semantics<parallel>, #tpu.dimension_semantics<arbitrary>], iteration_bounds = array<i64: 1, 1>, scalar_prefetch = 0 : i64, scratch_operands = 1 : i64, tpu.core_type = #tpu.core_type<tc>, window_params = [{transform_indices = @transform_0, window_bounds = array<i64: 128, 128>}, {pipeline_mode = #tpu.pipeline_mode<synchronous>, transform_indices = @transform_1, window_bounds = array<i64: 128, 20>}, {pipeline_mode = #tpu.pipeline_mode<synchronous>, transform_indices = @transform_2, window_bounds = array<i64: 1, 20>}, {transform_indices = @transform_3, window_bounds = array<i64: 128, 20>}]} {
    %c0_i32 = arith.constant 0 : i32
    %0 = arith.cmpi eq, %arg1, %c0_i32 : i32
    %1 = arith.extui %0 : i1 to i32
    %c0_i32_0 = arith.constant 0 : i32
    %2 = arith.cmpi ne, %1, %c0_i32_0 : i32
    scf.if %2 {
      %cst_9 = arith.constant 0.000000e+00 : f32
      %15 = vector.broadcast %cst_9 : f32 to vector<128x20xf32>
      %c0_10 = arith.constant 0 : index
      %c0_11 = arith.constant 0 : index
      %16 = vector.load %arg6[%c0_10, %c0_11] : memref<128x20xf32, #tpu.memory_space<vmem>>, vector<128x20xf32>
      tpu.vector_store %arg6[%c0_10, %c0_11], %15 {strides = array<i32>} : memref<128x20xf32, #tpu.memory_space<vmem>>, vector<128x20xf32>,
    } else {
    }
    %c128_i32 = arith.constant 128 : i32
    %3 = arith.muli %arg1, %c128_i32 : i32
    %4 = tpu.assume_multiple %3, 128 : i32
    %c0 = arith.constant 0 : index
    %c0_1 = arith.constant 0 : index
    %5 = vector.load %arg6[%c0, %c0_1] : memref<128x20xf32, #tpu.memory_space<vmem>>, vector<128x20xf32>
    %c0_2 = arith.constant 0 : index
    %c0_3 = arith.constant 0 : index
    %6 = vector.load %arg2[%c0_2, %c0_3] : memref<128x128xbf16, #tpu.memory_space<vmem>>, vector<128x128xbf16>
    %7 = arith.index_cast %4 : i32 to index
    %c0_4 = arith.constant 0 : index
    %8 = vector.load %arg3[%7, %c0_4] : memref<128x20xbf16, #tpu.memory_space<vmem>>, vector<128x20xbf16>
    %cst = arith.constant dense<0.000000e+00> : vector<128x20xf32>
    %9 = tpu.matmul %6, %8, %cst {dimension_numbers = #tpu.dot_dimension_numbers<[1], [0], [0], [1], [0, 0, 1, 1], [], []>} : vector<128x128xbf16>, vector<128x20xbf16>, vector<128x20xf32> -> vector<128x20xf32>
    %10 = arith.addf %5, %9 : vector<128x20xf32>
    %c0_5 = arith.constant 0 : index
    %c0_6 = arith.constant 0 : index
    %11 = vector.load %arg6[%c0_5, %c0_6] : memref<128x20xf32, #tpu.memory_space<vmem>>, vector<128x20xf32>
    tpu.vector_store %arg6[%c0_5, %c0_6], %10 {strides = array<i32>} : memref<128x20xf32, #tpu.memory_space<vmem>>, vector<128x20xf32>,
    %c0_i32_7 = arith.constant 0 : i32
    %12 = arith.cmpi eq, %arg1, %c0_i32_7 : i32
    %13 = arith.extui %12 : i1 to i32
    %c0_i32_8 = arith.constant 0 : i32
    %14 = arith.cmpi ne, %13, %c0_i32_8 : i32
    scf.if %14 {
      %c0_9 = arith.constant 0 : index
      %c0_10 = arith.constant 0 : index
      %15 = vector.load %arg6[%c0_9, %c0_10] : memref<128x20xf32, #tpu.memory_space<vmem>>, vector<128x20xf32>
      %c0_11 = arith.constant 0 : index
      %c0_12 = arith.constant 0 : index
      %16 = vector.load %arg4[%c0_11, %c0_12] : memref<1x20xf32, #tpu.memory_space<vmem>>, vector<1x20xf32>
      %17 = vector.broadcast %16 : vector<1x20xf32> to vector<128x20xf32>
      %18 = arith.addf %15, %17 : vector<128x20xf32>
      %19 = arith.mulf %18, %18 : vector<128x20xf32>
      %cst_13 = arith.constant dense<0.000000e+00> : vector<128xf32>
      %20 = vector.multi_reduction <add>, %19, %cst_13 [1] : vector<128x20xf32> to vector<128xf32>
      %21 = vector.shape_cast %20 : vector<128xf32> to vector<128x1xf32>
      %cst_14 = arith.constant 1.000000e-24 : f32
      %22 = vector.broadcast %cst_14 : f32 to vector<128x1xf32>
      %23 = arith.maximumf %21, %22 : vector<128x1xf32>
      %24 = math.rsqrt %23 : vector<128x1xf32>
      %25 = vector.broadcast %24 : vector<128x1xf32> to vector<128x20xf32>
      %26 = arith.mulf %18, %25 : vector<128x20xf32>
      %cst_15 = arith.constant 0.000000e+00 : f32
      %27 = vector.broadcast %cst_15 : f32 to vector<128x20xf32>
      %28 = arith.maximumf %26, %27 : vector<128x20xf32>
      %29 = arith.truncf %28 : vector<128x20xf32> to vector<128x20xbf16>
      %c0_16 = arith.constant 0 : index
      %c0_17 = arith.constant 0 : index
      %30 = vector.load %arg5[%c0_16, %c0_17] : memref<128x20xbf16, #tpu.memory_space<vmem>>, vector<128x20xbf16>
      tpu.vector_store %arg5[%c0_16, %c0_17], %29 {strides = array<i32>} : memref<128x20xbf16, #tpu.memory_space<vmem>>, vector<128x20xbf16>,
    } else {
    }
    return
  }
  func.func @transform_0(%arg0: i32, %arg1: i32) -> (i32, i32) {
    %c0_i32 = arith.constant 0 : i32
    return %arg0, %arg1 : i32, i32
  }
  func.func @transform_1(%arg0: i32, %arg1: i32) -> (i32, i32) {
    %c0_i32 = arith.constant 0 : i32
    %c0_i32_0 = arith.constant 0 : i32
    %c0_i32_1 = arith.constant 0 : i32
    return %c0_i32, %c0_i32_0 : i32, i32
  }
  func.func @transform_2(%arg0: i32, %arg1: i32) -> (i32, i32) {
    %c0_i32 = arith.constant 0 : i32
    %c0_i32_0 = arith.constant 0 : i32
    %c0_i32_1 = arith.constant 0 : i32
    return %c0_i32, %c0_i32_0 : i32, i32
  }
  func.func @transform_3(%arg0: i32, %arg1: i32) -> (i32, i32) {
    %c0_i32 = arith.constant 0 : i32
    %c0_i32_0 = arith.constant 0 : i32
    return %arg0, %c0_i32 : i32, i32
  }
}

</mosaic_0001>

<bundles_post_ra>
// kernel: tpu_custom_call.1
= control target key start
LH: loop header
LB: loop body
LE: loop exit
PB: predicated region body
PF: predicated region fallthrough
CT: control target
= control target key end

     0   :  { %vm19_vm0 = vcmask 162816   ;;  %v734_v1 = vmov 0.0   ;;  %vm549_vm1 = vcmask 158720   ;;  %s1016_s1 = inlined_call_operand.vmem [shape: bf16[128,20], index: 1, kind: input, shape index: {}]   ;;  %s1017_s0 = inlined_call_operand.vmem [shape: bf16[128,128], index: 0, kind: input, shape index: {}]   ;;  %s1018_s2 = inlined_call_operand.vmem [shape: f32[1,20], index: 2, kind: input, shape index: {}]   ;;  %s1019_s3 = inlined_call_operand.vmem [shape: bf16[128,20], index: 3, kind: output, shape index: {}]  }
   0x1   :  { %v686_v0 = vld [vmem:[%s1016_s1 + $0x38] sm:$0xff]   ;;  %22 = vst.msk [vmem:[#allocation2 + $0x10] sm:$0xff] %vm19_vm0, %v734_v1  ;;  %20 = vst.msk [vmem:[#allocation2] sm:$0xff] %vm19_vm0, %v734_v1  ;;  %v687_v2 = vld [vmem:[%s1016_s1 + $0x30] sm:$0xff]  }
   0x2   :  { %21 = vst.msk [vmem:[#allocation2 + $0x8] sm:$0xff] %vm19_vm0, %v734_v1  ;;  %23 = vst.msk [vmem:[#allocation2 + $0x18] sm:$0xff] %vm19_vm0, %v734_v1  ;;  %637 = vmatprep.subr.bf16.mxu0 %v686_v0  ;;  %669 = vmatprep.subr.bf16.mxu1 %v686_v0  ;;  %v688_v3 = vld [vmem:[%s1016_s1 + $0x28] sm:$0xff]   ;;  %v689_v4 = vld [vmem:[%s1016_s1 + $0x20] sm:$0xff]  }
   0x3   :  { %24 = vst.msk [vmem:[#allocation2 + $0x20] sm:$0xff] %vm19_vm0, %v734_v1  ;;  %25 = vst.msk [vmem:[#allocation2 + $0x28] sm:$0xff] %vm19_vm0, %v734_v1  ;;  %638 = vmatpush3.bf16.msra.mxu0 %v686_v0  ;;  %677 = vmatpush3.bf16.msra.mxu1 %v686_v0  ;;  %v694_v5 = vld [vmem:[%s1017_s0] sm:$0xff]   ;;  %v690_v7 = vld [vmem:[%s1016_s1 + $0x18] sm:$0xff]  }
   0x4   :  { %26 = vst.msk [vmem:[#allocation2 + $0x30] sm:$0xff] %vm19_vm0, %v734_v1  ;;  %27 = vst.msk [vmem:[#allocation2 + $0x38] sm:$0xff] %vm19_vm0, %v734_v1  ;;  %639 = vmatprep.subr.bf16.mxu0 %v687_v2  ;;  %670 = vmatprep.subr.bf16.mxu1 %v687_v2  ;;  %v695_v6 = vld [vmem:[%s1017_s0 + $0x20] sm:$0xff]   ;;  %v691_v8 = vld [vmem:[%s1016_s1 + $0x10] sm:$0xff]  }
   0x5   :  { %28 = vst.msk [vmem:[#allocation2 + $0x40] sm:$0xff] %vm19_vm0, %v734_v1  ;;  %29 = vst.msk [vmem:[#allocation2 + $0x48] sm:$0xff] %vm19_vm0, %v734_v1  ;;  %653 = vmatprep.mubr.bf16.mxu0 %v694_v5  ;;  %661 = vmatprep.mubr.bf16.mxu1 %v695_v6  ;;  %v692_v9 = vld [vmem:[%s1016_s1 + $0x8] sm:$0xff]   ;;  %v693_v10 = vld [vmem:[%s1016_s1] sm:$0xff]  }
   0x6   :  { %30 = vst.msk [vmem:[#allocation2 + $0x50] sm:$0xff] %vm19_vm0, %v734_v1  ;;  %31 = vst.msk [vmem:[#allocation2 + $0x58] sm:$0xff] %vm19_vm0, %v734_v1  ;;  %v696_v11 = vld [vmem:[%s1017_s0 + $0x8] sm:$0xff]   ;;  %v698_v13 = vld [vmem:[%s1017_s0 + $0x10] sm:$0xff]  }
   0x7   :  { %32 = vst.msk [vmem:[#allocation2 + $0x60] sm:$0xff] %vm19_vm0, %v734_v1  ;;  %33 = vst.msk [vmem:[#allocation2 + $0x68] sm:$0xff] %vm19_vm0, %v734_v1  ;;  %640 = vmatpush3.bf16.msra.mxu0 %v687_v2  ;;  %678 = vmatpush3.bf16.msra.mxu1 %v687_v2  ;;  %v697_v12 = vld [vmem:[%s1017_s0 + $0x28] sm:$0xff]   ;;  %v700_v14 = vld [vmem:[%s1017_s0 + $0x30] sm:$0xff]  }
   0x8   :  { %34 = vst.msk [vmem:[#allocation2 + $0x70] sm:$0xff] %vm19_vm0, %v734_v1  ;;  %35 = vst.msk [vmem:[#allocation2 + $0x78] sm:$0xff] %vm19_vm0, %v734_v1  ;;  %641 = vmatprep.subr.bf16.mxu0 %v688_v3  ;;  %671 = vmatprep.subr.bf16.mxu1 %v688_v3  ;;  %v699_v15 = vld [vmem:[%s1017_s0 + $0x18] sm:$0xff]   ;;  %v39_v17 = vld [vmem:[#allocation2 + $0x10] sm:$0xff] }
   0x9   :  { %v701_v16 = vld [vmem:[%s1017_s0 + $0x38] sm:$0xff]   ;;  %v37_v21 = vld [vmem:[#allocation2] sm:$0xff]  ;;  %v38_v33 = vld [vmem:[#allocation2 + $0x8] sm:$0xff] }
   0xa   :  { %v40_v27 = vld [vmem:[#allocation2 + $0x18] sm:$0xff]  ;;  %v41_v44 = vld [vmem:[#allocation2 + $0x20] sm:$0xff]  ;;  %v42_v57 = vld [vmem:[#allocation2 + $0x28] sm:$0xff] }
   0xb   :  { %642 = vmatpush3.bf16.msra.mxu0 %v688_v3  ;;  %679 = vmatpush3.bf16.msra.mxu1 %v688_v3  ;;  %v43_v39 = vld [vmem:[#allocation2 + $0x30] sm:$0xff]  ;;  %v828_v47 = vld [vmem:[%s1018_s2] ss:$0 sm:$0xff]  ;;  %v44_v49 = vld [vmem:[#allocation2 + $0x38] sm:$0xff] }
   0xc   :  { %643 = vmatprep.subr.bf16.mxu0 %v689_v4  ;;  %672 = vmatprep.subr.bf16.mxu1 %v689_v4  ;;  %v45_v22 = vld [vmem:[#allocation2 + $0x40] sm:$0xff]  ;;  %v46_v34 = vld [vmem:[#allocation2 + $0x48] sm:$0xff] }
   0xd   :  { %v47_v18 = vld [vmem:[#allocation2 + $0x50] sm:$0xff]  ;;  %v48_v28 = vld [vmem:[#allocation2 + $0x58] sm:$0xff] }
   0xe   :  { %v49_v46 = vld [vmem:[#allocation2 + $0x60] sm:$0xff]  ;;  %v50_v63 = vld [vmem:[#allocation2 + $0x68] sm:$0xff] }
   0xf   :  { %644 = vmatpush3.bf16.msra.mxu0 %v689_v4  ;;  %680 = vmatpush3.bf16.msra.mxu1 %v689_v4  ;;  %v51_v40 = vld [vmem:[#allocation2 + $0x70] sm:$0xff]  ;;  %v52_v54 = vld [vmem:[#allocation2 + $0x78] sm:$0xff] }
  0x10   :  { %645 = vmatprep.subr.bf16.mxu0 %v690_v7  ;;  %673 = vmatprep.subr.bf16.mxu1 %v690_v7 }
  0x13   :  { %646 = vmatpush3.bf16.msra.mxu0 %v690_v7  ;;  %681 = vmatpush3.bf16.msra.mxu1 %v690_v7 }
  0x14   :  { %647 = vmatprep.subr.bf16.mxu0 %v691_v8  ;;  %674 = vmatprep.subr.bf16.mxu1 %v691_v8 }
  0x17   :  { %648 = vmatpush3.bf16.msra.mxu0 %v691_v8  ;;  %682 = vmatpush3.bf16.msra.mxu1 %v691_v8 }
  0x18   :  { %649 = vmatprep.subr.bf16.mxu0 %v692_v9  ;;  %675 = vmatprep.subr.bf16.mxu1 %v692_v9 }
  0x1b   :  { %650 = vmatpush3.bf16.msra.mxu0 %v692_v9  ;;  %683 = vmatpush3.bf16.msra.mxu1 %v692_v9 }
  0x1c   :  { %651 = vmatprep.subr.bf16.mxu0 %v693_v10  ;;  %676 = vmatprep.subr.bf16.mxu1 %v693_v10 }
  0x1f   :  { %652 = vmatpush3.bf16.msra.mxu0 %v693_v10  ;;  %684 = vmatpush3.bf16.msra.mxu1 %v693_v10 }
  0x22   :  { %654 = vmatmul.mubr.bf16.vlgmr.msra.gmra.mxu0 %v696_v11  ;;  %662 = vmatmul.mubr.bf16.vlgmr.msra.gmra.mxu1 %v697_v12 }
  0x23   :  { %657 = vmatprep.mubr.bf16.mxu0 %v698_v13  ;;  %665 = vmatprep.mubr.bf16.mxu1 %v700_v14 }
  0x2a   :  { %658 = vmatmul.mubr.bf16.gmra.mxu0 %v699_v15  ;;  %666 = vmatmul.mubr.bf16.gmra.mxu1 %v701_v16 }
  0xe2   :  { %v655_v19 = vpop.f32.mrf.mxu0  ;;  %v663_v20 = vpop.f32.mrf.mxu1 }
  0xe3   :  { %v284_v23 = vadd.f32 %v655_v19, %v39_v17  ;;  %v292_v24 = vadd.f32 %v663_v20, %v47_v18 }
  0xe4   :  { %v219_v25 = vpop.f32.mrf.mxu0  ;;  %v251_v26 = vpop.f32.mrf.mxu1 }
  0xe5   :  { %301 = vst.msk [vmem:[#allocation2 + $0x10] sm:$0xff] %vm19_vm0, %v284_v23  ;;  %309 = vst.msk [vmem:[#allocation2 + $0x50] sm:$0xff] %vm19_vm0, %v292_v24  ;;  %v282_v29 = vadd.f32 %v219_v25, %v37_v21  ;;  %v290_v30 = vadd.f32 %v251_v26, %v45_v22 }
  0xe6   :  { %v656_v31 = vpop.f32.mrf.mxu0  ;;  %v664_v32 = vpop.f32.mrf.mxu1 }
  0xe7   :  { %299 = vst.msk [vmem:[#allocation2] sm:$0xff] %vm19_vm0, %v282_v29  ;;  %307 = vst.msk [vmem:[#allocation2 + $0x40] sm:$0xff] %vm19_vm0, %v290_v30  ;;  %v285_v35 = vadd.f32 %v656_v31, %v40_v27  ;;  %v293_v36 = vadd.f32 %v664_v32, %v48_v28 }
  0xe8   :  { %v222_v37 = vpop.f32.mrf.mxu0  ;;  %v254_v38 = vpop.f32.mrf.mxu1 }
  0xe9   :  { %302 = vst.msk [vmem:[#allocation2 + $0x18] sm:$0xff] %vm19_vm0, %v285_v35  ;;  %310 = vst.msk [vmem:[#allocation2 + $0x58] sm:$0xff] %vm19_vm0, %v293_v36  ;;  %v283_v41 = vadd.f32 %v222_v37, %v38_v33  ;;  %v291_v42 = vadd.f32 %v254_v38, %v46_v34 }
  0xea   :  { %v659_v43 = vpop.f32.mrf.mxu0  ;;  %v667_v45 = vpop.f32.mrf.mxu1 }
  0xeb   :  { %300 = vst.msk [vmem:[#allocation2 + $0x8] sm:$0xff] %vm19_vm0, %v283_v41  ;;  %308 = vst.msk [vmem:[#allocation2 + $0x48] sm:$0xff] %vm19_vm0, %v291_v42  ;;  %v288_v48 = vadd.f32 %v659_v43, %v43_v39  ;;  %v296_v50 = vadd.f32 %v667_v45, %v51_v40 }
  0xec   :  { %v235_v51 = vpop.f32.mrf.mxu0  ;;  %v267_v52 = vpop.f32.mrf.mxu1  ;;  %v328_v53 = vld [vmem:[#allocation2 + $0x50] sm:$0xff] }
  0xed   :  { %v320_v55 = vld [vmem:[#allocation2 + $0x10] sm:$0xff]  ;;  %305 = vst.msk [vmem:[#allocation2 + $0x30] sm:$0xff] %vm19_vm0, %v288_v48  ;;  %v286_v56 = vadd.f32 %v235_v51, %v41_v44  ;;  %313 = vst.msk [vmem:[#allocation2 + $0x70] sm:$0xff] %vm19_vm0, %v296_v50  ;;  %v294_v58 = vadd.f32 %v267_v52, %v49_v46  ;;  %v835_v59 = vadd.f32 %v828_v47, %v328_v53 }
  0xee   :  { %v838_v60 = vadd.f32 %v828_v47, %v320_v55  ;;  %v660_v61 = vpop.f32.mrf.mxu0  ;;  %v668_v62 = vpop.f32.mrf.mxu1  ;;  %v318_v0 = vld [vmem:[#allocation2] sm:$0xff] }
  0xef   :  { %v326_v1 = vld [vmem:[#allocation2 + $0x40] sm:$0xff]  ;;  %303 = vst.msk [vmem:[#allocation2 + $0x20] sm:$0xff] %vm19_vm0, %v286_v56  ;;  %v289_v2 = vadd.f32 %v660_v61, %v44_v49  ;;  %311 = vst.msk [vmem:[#allocation2 + $0x60] sm:$0xff] %vm19_vm0, %v294_v58  ;;  %v367_v3 = vmul.f32 %v835_v59, %v835_v59  ;;  %v297_v4 = vadd.f32 %v668_v62, %v52_v54 }
  0xf0   :  { %v359_v5 = vmul.f32 %v838_v60, %v838_v60  ;;  %v238_v6 = vpop.f32.mrf.mxu0  ;;  %v270_v7 = vpop.f32.mrf.mxu1  ;;  %v847_v8 = vadd.f32 %v828_v47, %v318_v0  ;;  %v321_v9 = vld [vmem:[#allocation2 + $0x18] sm:$0xff]  ;;  %v850_v10 = vadd.f32 %v828_v47, %v326_v1 }
  0xf1   :  { %v329_v11 = vld [vmem:[#allocation2 + $0x58] sm:$0xff]  ;;  %306 = vst.msk [vmem:[#allocation2 + $0x38] sm:$0xff] %vm19_vm0, %v289_v2  ;;  %v287_v12 = vadd.f32 %v238_v6, %v42_v57  ;;  %v403_v13 = vsel %vm19_vm0, %v367_v3, 0.0  ;;  %314 = vst.msk [vmem:[#allocation2 + $0x78] sm:$0xff] %vm19_vm0, %v297_v4  ;;  %v295_v15 = vadd.f32 %v270_v7, %v50_v63  ;;  %v859_v17 = vadd.f32 %v828_v47, %v321_v9 }
  0xf2   :  { %v379_v14 = vsel %vm19_vm0, %v359_v5, 0.0  ;;  %404 = vadd.xlane.f32.xlu0 %v403_v13  ;;  %v357_v16 = vmul.f32 %v847_v8, %v847_v8  ;;  %v319_v18 = vld [vmem:[#allocation2 + $0x8] sm:$0xff]  ;;  %v864_v19 = vadd.f32 %v828_v47, %v329_v11  ;;  %v365_v23 = vmul.f32 %v850_v10, %v850_v10 }
  0xf3   :  { %380 = vadd.xlane.f32.xlu1 %v379_v14  ;;  %304 = vst.msk [vmem:[#allocation2 + $0x28] sm:$0xff] %vm19_vm0, %v287_v12  ;;  %312 = vst.msk [vmem:[#allocation2 + $0x68] sm:$0xff] %vm19_vm0, %v295_v15  ;;  %v327_v20 = vld [vmem:[#allocation2 + $0x48] sm:$0xff]  ;;  %v360_v21 = vmul.f32 %v859_v17, %v859_v17  ;;  %v872_v24 = vadd.f32 %v828_v47, %v319_v18 }
  0xf4   :  { %v373_v22 = vsel %vm19_vm0, %v357_v16, 0.0  ;;  %v368_v26 = vmul.f32 %v864_v19, %v864_v19  ;;  %v878_v27 = vadd.f32 %v828_v47, %v327_v20  ;;  %v324_v28 = vld [vmem:[#allocation2 + $0x30] sm:$0xff]  ;;  %v397_v30 = vsel %vm19_vm0, %v365_v23, 0.0 }
  0xf5   :  { %v382_v25 = vsel %vm19_vm0, %v360_v21, 0.0  ;;  %v358_v31 = vmul.f32 %v872_v24, %v872_v24  ;;  %v884_v32 = vadd.f32 %v828_v47, %v324_v28  ;;  %v332_v53 = vld [vmem:[#allocation2 + $0x70] sm:$0xff] }
  0xf6   :  { %374 = vadd.xlane.f32.xlu0 %v373_v22  ;;  %v406_v33 = vsel %vm19_vm0, %v368_v26, 0.0  ;;  %v366_v34 = vmul.f32 %v878_v27, %v878_v27  ;;  %v322_v36 = vld [vmem:[#allocation2 + $0x20] sm:$0xff]  ;;  %v920_v57 = vadd.f32 %v828_v47, %v332_v53 }
  0xf7   :  { %383 = vadd.xlane.f32.xlu1 %v382_v25  ;;  %v376_v38 = vsel %vm19_vm0, %v358_v31, 0.0  ;;  %v363_v39 = vmul.f32 %v884_v32, %v884_v32  ;;  %v896_v40 = vadd.f32 %v828_v47, %v322_v36  ;;  %v330_v44 = vld [vmem:[#allocation2 + $0x60] sm:$0xff] }
  0xf8   :  { %v325_v29 = vld [vmem:[#allocation2 + $0x38] sm:$0xff]  ;;  %v400_v41 = vsel %vm19_vm0, %v366_v34, 0.0  ;;  %v908_v49 = vadd.f32 %v828_v47, %v330_v44  ;;  %v371_v0 = vmul.f32 %v920_v57, %v920_v57 }
  0xf9   :  { %v890_v35 = vadd.f32 %v828_v47, %v325_v29  ;;  %v391_v46 = vsel %vm19_vm0, %v363_v39, 0.0  ;;  %v361_v48 = vmul.f32 %v896_v40, %v896_v40  ;;  %v333_v54 = vld [vmem:[#allocation2 + $0x78] sm:$0xff] }
  0xfa   :  { %398 = vadd.xlane.f32.xlu0 %v397_v30  ;;  %v323_v37 = vld [vmem:[#allocation2 + $0x28] sm:$0xff]  ;;  %v369_v56 = vmul.f32 %v908_v49, %v908_v49  ;;  %v926_v62 = vadd.f32 %v828_v47, %v333_v54  ;;  %v415_v3 = vsel %vm19_vm0, %v371_v0, 0.0 }
  0xfb   :  { %407 = vadd.xlane.f32.xlu1 %v406_v33  ;;  %v364_v42 = vmul.f32 %v890_v35, %v890_v35  ;;  %v902_v43 = vadd.f32 %v828_v47, %v323_v37  ;;  %v331_v45 = vld [vmem:[#allocation2 + $0x68] sm:$0xff]  ;;  %v385_v55 = vsel %vm19_vm0, %v361_v48, 0.0 }
  0xfc   :  { %v914_v52 = vadd.f32 %v828_v47, %v331_v45  ;;  %v409_v63 = vsel %vm19_vm0, %v369_v56, 0.0  ;;  %v372_v2 = vmul.f32 %v926_v62, %v926_v62 }
  0xfd   :  { %v394_v50 = vsel %vm19_vm0, %v364_v42, 0.0  ;;  %v362_v51 = vmul.f32 %v902_v43, %v902_v43 }
  0xfe   :  { %377 = vadd.xlane.f32.xlu0 %v376_v38  ;;  %v370_v61 = vmul.f32 %v914_v52, %v914_v52  ;;  %v418_v4 = vsel %vm19_vm0, %v372_v2, 0.0 }
  0xff   :  { %401 = vadd.xlane.f32.xlu1 %v400_v41  ;;  %v388_v58 = vsel %vm19_vm0, %v362_v51, 0.0 }
 0x100   :  { %v412_v1 = vsel %vm19_vm0, %v370_v61, 0.0 }
 0x102   :  { %392 = vadd.xlane.f32.xlu0 %v391_v46 }
 0x103   :  { %395 = vadd.xlane.f32.xlu1 %v394_v50 }
 0x106   :  { %386 = vadd.xlane.f32.xlu0 %v385_v55 }
 0x107   :  { %389 = vadd.xlane.f32.xlu1 %v388_v58 }
 0x10a   :  { %410 = vadd.xlane.f32.xlu0 %v409_v63 }
 0x10b   :  { %413 = vadd.xlane.f32.xlu1 %v412_v1 }
 0x10e   :  { %416 = vadd.xlane.f32.xlu0 %v415_v3 }
 0x10f   :  { %419 = vadd.xlane.f32.xlu1 %v418_v4 }
 0x17b   :  { %v405_v47 = vpop.xlane.xlu0 %404 }
 0x17c   :  { %v381_v5 = vpop.xlane.xlu1 %380  ;;  %v431_v6 = vmax.f32 %v405_v47, 1e-24 }
 0x17d   :  { %v423_v7 = vmax.f32 %v381_v5, 1e-24 }
 0x17e   :  { %702 = vrsqrt.f32 %v431_v6 }
 0x17f   :  { %704 = vrsqrt.f32 %v423_v7  ;;  %v375_v9 = vpop.xlane.xlu0 %374 }
 0x180   :  { %v421_v11 = vmax.f32 %v375_v9, 1e-24  ;;  %v384_v12 = vpop.xlane.xlu1 %383 }
 0x181   :  { %v424_v13 = vmax.f32 %v384_v12, 1e-24 }
 0x182   :  { %706 = vrsqrt.f32 %v421_v11 }
 0x183   :  { %708 = vrsqrt.f32 %v424_v13  ;;  %v399_v14 = vpop.xlane.xlu0 %398 }
 0x184   :  { %v429_v15 = vmax.f32 %v399_v14, 1e-24  ;;  %v408_v16 = vpop.xlane.xlu1 %407 }
 0x185   :  { %v432_v18 = vmax.f32 %v408_v16, 1e-24 }
 0x186   :  { %710 = vrsqrt.f32 %v429_v15 }
 0x187   :  { %712 = vrsqrt.f32 %v432_v18  ;;  %v378_v20 = vpop.xlane.xlu0 %377 }
 0x188   :  { %v402_v21 = vpop.xlane.xlu1 %401  ;;  %v422_v22 = vmax.f32 %v378_v20, 1e-24 }
 0x189   :  { %v430_v23 = vmax.f32 %v402_v21, 1e-24 }
 0x18a   :  { %714 = vrsqrt.f32 %v422_v22 }
 0x18b   :  { %v703_v25 = vpop.eup %702  ;;  %716 = vrsqrt.f32 %v430_v23  ;;  %v393_v26 = vpop.xlane.xlu0 %392 }
 0x18c   :  { %v705_v28 = vpop.eup %704  ;;  %v463_v29 = vmul.f32 %v703_v25, %v835_v59  ;;  %v427_v30 = vmax.f32 %v393_v26, 1e-24  ;;  %v396_v31 = vpop.xlane.xlu1 %395 }
 0x18d   :  { %v455_v33 = vmul.f32 %v705_v28, %v838_v60  ;;  %v428_v34 = vmax.f32 %v396_v31, 1e-24 }
 0x18e   :  { %v479_v36 = vmax.f32 %v463_v29, 0.0  ;;  %718 = vrsqrt.f32 %v427_v30 }
 0x18f   :  { %v707_v37 = vpop.eup %706  ;;  %v471_v38 = vmax.f32 %v455_v33, 0.0  ;;  %720 = vrsqrt.f32 %v428_v34  ;;  %v387_v39 = vpop.xlane.xlu0 %386 }
 0x190   :  { %v709_v41 = vpop.eup %708  ;;  %v615_v42 = vpack.c.bf16 %v479_v36, %v479_v36  ;;  %v453_v44 = vmul.f32 %v707_v37, %v847_v8  ;;  %v425_v45 = vmax.f32 %v387_v39, 1e-24  ;;  %v390_v46 = vpop.xlane.xlu1 %389 }
 0x191   :  { %v607_v48 = vpack.c.bf16 %v471_v38, %v471_v38  ;;  %v456_v59 = vmul.f32 %v709_v41, %v859_v17  ;;  %v426_v50 = vmax.f32 %v390_v46, 1e-24 }
 0x192   :  { %560 = vst.msk [vmem:[%s1019_s3 + $0x28] sm:$0xf] %vm549_vm1, %v615_v42  ;;  %v469_v60 = vmax.f32 %v453_v44, 0.0  ;;  %722 = vrsqrt.f32 %v425_v45 }
 0x193   :  { %v711_v51 = vpop.eup %710  ;;  %552 = vst.msk [vmem:[%s1019_s3 + $0x8] sm:$0xf] %vm549_vm1, %v607_v48  ;;  %v472_v8 = vmax.f32 %v456_v59, 0.0  ;;  %724 = vrsqrt.f32 %v426_v50  ;;  %v411_v53 = vpop.xlane.xlu0 %410 }
 0x194   :  { %v713_v54 = vpop.eup %712  ;;  %v605_v55 = vpack.c.bf16 %v469_v60, %v469_v60  ;;  %v461_v17 = vmul.f32 %v711_v51, %v850_v10  ;;  %v433_v56 = vmax.f32 %v411_v53, 1e-24  ;;  %v414_v58 = vpop.xlane.xlu1 %413 }
 0x195   :  { %v608_v61 = vpack.c.bf16 %v472_v8, %v472_v8  ;;  %v464_v63 = vmul.f32 %v713_v54, %v864_v19  ;;  %v434_v0 = vmax.f32 %v414_v58, 1e-24 }
 0x196   :  { %550 = vst.msk [vmem:[%s1019_s3] sm:$0xf] %vm549_vm1, %v605_v55  ;;  %v477_v1 = vmax.f32 %v461_v17, 0.0  ;;  %726 = vrsqrt.f32 %v433_v56 }
 0x197   :  { %v715_v2 = vpop.eup %714  ;;  %553 = vst.msk [vmem:[%s1019_s3 + $0xc] sm:$0xf] %vm549_vm1, %v608_v61  ;;  %v480_v10 = vmax.f32 %v464_v63, 0.0  ;;  %728 = vrsqrt.f32 %v434_v0  ;;  %v417_v3 = vpop.xlane.xlu0 %416 }
 0x198   :  { %v717_v4 = vpop.eup %716  ;;  %v613_v47 = vpack.c.bf16 %v477_v1, %v477_v1  ;;  %v454_v19 = vmul.f32 %v715_v2, %v872_v24  ;;  %v435_v5 = vmax.f32 %v417_v3, 1e-24  ;;  %v420_v6 = vpop.xlane.xlu1 %419 }
 0x199   :  { %v616_v7 = vpack.c.bf16 %v480_v10, %v480_v10  ;;  %v462_v9 = vmul.f32 %v717_v4, %v878_v27  ;;  %v436_v11 = vmax.f32 %v420_v6, 1e-24 }
 0x19a   :  { %558 = vst.msk [vmem:[%s1019_s3 + $0x20] sm:$0xf] %vm549_vm1, %v613_v47  ;;  %v470_v12 = vmax.f32 %v454_v19, 0.0  ;;  %730 = vrsqrt.f32 %v435_v5 }
 0x19b   :  { %v719_v13 = vpop.eup %718  ;;  %561 = vst.msk [vmem:[%s1019_s3 + $0x2c] sm:$0xf] %vm549_vm1, %v616_v7  ;;  %v478_v24 = vmax.f32 %v462_v9, 0.0  ;;  %732 = vrsqrt.f32 %v436_v11 }
 0x19c   :  { %v721_v14 = vpop.eup %720  ;;  %v606_v15 = vpack.c.bf16 %v470_v12, %v470_v12  ;;  %v459_v27 = vmul.f32 %v719_v13, %v884_v32 }
 0x19d   :  { %v614_v16 = vpack.c.bf16 %v478_v24, %v478_v24  ;;  %v460_v18 = vmul.f32 %v721_v14, %v890_v35 }
 0x19e   :  { %551 = vst.msk [vmem:[%s1019_s3 + $0x4] sm:$0xf] %vm549_vm1, %v606_v15  ;;  %v475_v20 = vmax.f32 %v459_v27, 0.0 }
 0x19f   :  { %v723_v21 = vpop.eup %722  ;;  %559 = vst.msk [vmem:[%s1019_s3 + $0x24] sm:$0xf] %vm549_vm1, %v614_v16  ;;  %v476_v22 = vmax.f32 %v460_v18, 0.0 }
 0x1a0   :  { %v725_v23 = vpop.eup %724  ;;  %v611_v25 = vpack.c.bf16 %v475_v20, %v475_v20  ;;  %v457_v32 = vmul.f32 %v723_v21, %v896_v40 }
 0x1a1   :  { %v612_v26 = vpack.c.bf16 %v476_v22, %v476_v22  ;;  %v458_v35 = vmul.f32 %v725_v23, %v902_v43 }
 0x1a2   :  { %556 = vst.msk [vmem:[%s1019_s3 + $0x18] sm:$0xf] %vm549_vm1, %v611_v25  ;;  %v473_v28 = vmax.f32 %v457_v32, 0.0 }
 0x1a3   :  { %v727_v29 = vpop.eup %726  ;;  %557 = vst.msk [vmem:[%s1019_s3 + $0x1c] sm:$0xf] %vm549_vm1, %v612_v26  ;;  %v474_v30 = vmax.f32 %v458_v35, 0.0 }
 0x1a4   :  { %v729_v31 = vpop.eup %728  ;;  %v609_v33 = vpack.c.bf16 %v473_v28, %v473_v28  ;;  %v465_v40 = vmul.f32 %v727_v29, %v908_v49 }
 0x1a5   :  { %v610_v34 = vpack.c.bf16 %v474_v30, %v474_v30  ;;  %v466_v43 = vmul.f32 %v729_v31, %v914_v52 }
 0x1a6   :  { %554 = vst.msk [vmem:[%s1019_s3 + $0x10] sm:$0xf] %vm549_vm1, %v609_v33  ;;  %v481_v36 = vmax.f32 %v465_v40, 0.0 }
 0x1a7   :  { %v731_v37 = vpop.eup %730  ;;  %555 = vst.msk [vmem:[%s1019_s3 + $0x14] sm:$0xf] %vm549_vm1, %v610_v34  ;;  %v482_v38 = vmax.f32 %v466_v43, 0.0 }
 0x1a8   :  { %v733_v39 = vpop.eup %732  ;;  %v617_v41 = vpack.c.bf16 %v481_v36, %v481_v36  ;;  %v467_v49 = vmul.f32 %v731_v37, %v920_v57 }
 0x1a9   :  { %v618_v42 = vpack.c.bf16 %v482_v38, %v482_v38  ;;  %v468_v52 = vmul.f32 %v733_v39, %v926_v62 }
 0x1aa   :  { %562 = vst.msk [vmem:[%s1019_s3 + $0x30] sm:$0xf] %vm549_vm1, %v617_v41  ;;  %v483_v44 = vmax.f32 %v467_v49, 0.0 }
 0x1ab   :  { %563 = vst.msk [vmem:[%s1019_s3 + $0x34] sm:$0xf] %vm549_vm1, %v618_v42  ;;  %v484_v45 = vmax.f32 %v468_v52, 0.0 }
 0x1ac   :  { %v619_v46 = vpack.c.bf16 %v483_v44, %v483_v44 }
 0x1ad   :  { %v620_v48 = vpack.c.bf16 %v484_v45, %v484_v45 }
 0x1ae   :  { %564 = vst.msk [vmem:[%s1019_s3 + $0x38] sm:$0xf] %vm549_vm1, %v619_v46 }
 0x1af   :  { %565 = vst.msk [vmem:[%s1019_s3 + $0x3c] sm:$0xf] %vm549_vm1, %v620_v48 }

</bundles_post_ra>
